<compile_context>
chip_gen: v5e
topology: v5e:2x2
jax: 0.10.0
libtpu: 0.0.40
codegen_flags: <defaults>
</compile_context>

<pallas_src>
import math

import jax
import jax.numpy as jnp
from jax.experimental import pallas as pl
from jax.experimental.pallas import tpu as pltpu


# ----------------------------- model sizes ---------------------------------
OBS_DIM = 16
ACTION_DIM = 4
HIDDEN = 32
BATCH = 8

FUSED = 128                      # padded fused hidden / output width (3*HIDDEN=96 -> 128)
OUT_W = 128                      # lane-dense output slab width


def _round_up(x, m):
    return ((x + m - 1) // m) * m


# Packed-weights row layout (all offsets 8-aligned, 128 lanes wide).
OBS_PAD = _round_up(OBS_DIM, 8)
R_W1 = 0                         # (OBS_DIM, FUSED)  layer-1 weights, concat along out dim
R_B1 = R_W1 + OBS_PAD            # row R_B1 holds fused bias 1
R_W2 = R_B1 + 8                  # (FUSED, FUSED)    block-diagonal layer-2 weights
R_B2 = R_W2 + FUSED
R_W3 = R_B2 + 8                  # (FUSED, FUSED)    block-diagonal layer-3 weights
R_B3 = R_W3 + FUSED
PACK_ROWS = R_B3 + 8             # = 296 for the default sizes

# Output-slab column layout.
C_PROB = 0                       # a_prob   [0 : A)
C_LOGP = ACTION_DIM              # log_prob [A : 2A)
C_Q1 = 2 * ACTION_DIM            # q1 gathered at action
C_Q2 = C_Q1 + 1                  # q2 gathered at action
C_ENT = C_Q1 + 2                 # entropy
C_MINQ = C_Q1 + 3                # min_q
_USED_COLS = 2 * ACTION_DIM + 4


# ----------------------------- fused kernel --------------------------------
def _sac_fused_kernel(log_alpha_ref, s_ref, a_ref, w_ref, out_ref):
    s = s_ref[...]                                            # (B, obs_dim)
    B = s.shape[0]
    A = ACTION_DIM

    # Static slices into the single packed-weights VMEM buffer.
    w1 = w_ref[R_W1:R_W1 + OBS_DIM, :]                        # (obs_dim, 128)
    b1 = w_ref[R_B1:R_B1 + 1, :]                              # (1, 128)
    w2 = w_ref[R_W2:R_W2 + FUSED, :]                          # (128, 128) block-diag
    b2 = w_ref[R_B2:R_B2 + 1, :]
    w3 = w_ref[R_W3:R_W3 + FUSED, :]                          # (128, 128) block-diag
    b3 = w_ref[R_B3:R_B3 + 1, :]

    # Three fused MXU matmuls cover actor + critic1 + critic2.
    h1 = jnp.maximum(jnp.dot(s, w1, preferred_element_type=jnp.float32) + b1, 0.0)
    h2 = jnp.maximum(jnp.dot(h1, w2, preferred_element_type=jnp.float32) + b2, 0.0)
    y = jnp.dot(h2, w3, preferred_element_type=jnp.float32) + b3      # (B, 128)

    logits = y[:, 0:A]                                        # actor head
    q1 = y[:, A:2 * A]                                        # critic1 head
    q2 = y[:, 2 * A:3 * A]                                    # critic2 head

    # Numerically stable softmax / log-softmax.
    m = jnp.max(logits, axis=-1, keepdims=True)
    sh = logits - m
    e = jnp.exp(sh)
    z = jnp.sum(e, axis=-1, keepdims=True)
    a_prob = e / z
    log_prob = sh - jnp.log(z)

    # alpha = exp(log_alpha), computed on the EUP as a vector exp.
    la = log_alpha_ref[0, 0]
    alpha = jnp.exp(la + jnp.zeros((B, 1), jnp.float32))      # (B, 1)

    plogp = jnp.sum(a_prob * log_prob, axis=-1, keepdims=True)
    entropy = -alpha * plogp                                  # (B, 1)
    min_q = jnp.sum(a_prob * jnp.minimum(q1, q2), axis=-1, keepdims=True)

    # gather(1, a): one-hot mask-reduce.
    a_idx = a_ref[...]                                        # (B, 1) int32
    col = jax.lax.broadcasted_iota(jnp.int32, (B, A), 1)
    onehot = (col == a_idx).astype(jnp.float32)
    q1_val = jnp.sum(q1 * onehot, axis=-1, keepdims=True)
    q2_val = jnp.sum(q2 * onehot, axis=-1, keepdims=True)

    # Single lane-dense (B, 128) output slab -> one unmasked store / one DMA.
    pad = jnp.zeros((B, OUT_W - _USED_COLS), jnp.float32)
    out_ref[...] = jnp.concatenate(
        [a_prob, log_prob, q1_val, q2_val, entropy, min_q, pad], axis=-1)


# ----------------------------- jitted wrappers ------------------------------
def _call_fused(log_alpha, s, a, packed_w):
    B = s.shape[0]
    vmem = pl.BlockSpec(memory_space=pltpu.MemorySpace.VMEM)
    smem = pl.BlockSpec(memory_space=pltpu.MemorySpace.SMEM)
    return pl.pallas_call(
        _sac_fused_kernel,
        out_shape=jax.ShapeDtypeStruct((B, OUT_W), jnp.float32),
        in_specs=[smem, vmem, vmem, vmem],
        out_specs=vmem,
    )(log_alpha.reshape(1, 1).astype(jnp.float32), s, a.astype(jnp.int32), packed_w)


@jax.jit
def _forward_critic_jit(log_alpha, s, a, packed_w):
    slab = _call_fused(log_alpha, s, a, packed_w)
    return slab[:, C_Q1:C_Q1 + 1], slab[:, C_Q2:C_Q2 + 1]


@jax.jit
def _forward_actor_jit(log_alpha, s, packed_w):
    dummy_a = jnp.zeros((s.shape[0], 1), jnp.int32)
    slab = _call_fused(log_alpha, s, dummy_a, packed_w)
    return (slab[:, C_PROB:C_PROB + ACTION_DIM],
            slab[:, C_LOGP:C_LOGP + ACTION_DIM],
            slab[:, C_ENT:C_ENT + 1],
            slab[:, C_MINQ:C_MINQ + 1])


# ----------------------------- parameter init ------------------------------
def _init_linear(key, fan_in, fan_out):
    """Deterministic PyTorch-style uniform(-1/sqrt(fan_in), 1/sqrt(fan_in))."""
    kw, kb = jax.random.split(key)
    bound = 1.0 / math.sqrt(fan_in)
    w = jax.random.uniform(kw, (fan_in, fan_out), jnp.float32, -bound, bound)
    b = jax.random.uniform(kb, (1, fan_out), jnp.float32, -bound, bound)
    return w, b


def _init_mlp(key, obs_dim, hidden, out_dim):
    k1, k2, k3 = jax.random.split(key, 3)
    w1, b1 = _init_linear(k1, obs_dim, hidden)
    w2, b2 = _init_linear(k2, hidden, hidden)
    w3, b3 = _init_linear(k3, hidden, out_dim)
    return (w1, b1, w2, b2, w3, b3)


def _pack_params(actor, critic1, critic2):
    """Pack actor/critic1/critic2 MLP params into one padded (PACK_ROWS, 128) array.

    Layer 1 weights are concatenated along the output dim; layers 2 / 3 are
    block-diagonal so that a single matmul per layer evaluates all three nets.
    Padded rows/cols are zero, so padded hidden units stay exactly 0 through ReLU.
    """
    packed = jnp.zeros((PACK_ROWS, FUSED), jnp.float32)
    for n, (w1, b1, w2, b2, w3, b3) in enumerate((actor, critic1, critic2)):
        h0 = n * HIDDEN
        o0 = n * ACTION_DIM
        packed = packed.at[R_W1:R_W1 + OBS_DIM, h0:h0 + HIDDEN].set(w1)
        packed = packed.at[R_B1, h0:h0 + HIDDEN].set(b1[0])
        packed = packed.at[R_W2 + h0:R_W2 + h0 + HIDDEN, h0:h0 + HIDDEN].set(w2)
        packed = packed.at[R_B2, h0:h0 + HIDDEN].set(b2[0])
        packed = packed.at[R_W3 + h0:R_W3 + h0 + HIDDEN, o0:o0 + ACTION_DIM].set(w3)
        packed = packed.at[R_B3, o0:o0 + ACTION_DIM].set(b3[0])
    return packed


# ----------------------------- SAC wrapper ---------------------------------
class SACPallas:
    def __init__(self, obs_dim, action_dim, key, init_alpha=0.01):
        assert obs_dim == OBS_DIM and action_dim == ACTION_DIM
        self.obs_dim = obs_dim
        self.action_dim = action_dim
        ka, kc1, kc2 = jax.random.split(key, 3)
        self.actor = _init_mlp(ka, obs_dim, HIDDEN, action_dim)
        self.critic1 = _init_mlp(kc1, obs_dim, HIDDEN, action_dim)
        self.critic2 = _init_mlp(kc2, obs_dim, HIDDEN, action_dim)
        # Targets initialized from the online critics (load_state_dict equiv.);
        # explicit copies so future training updates would not alias.
        self.critic1_target = tuple(jnp.array(p) for p in self.critic1)
        self.critic2_target = tuple(jnp.array(p) for p in self.critic2)
        self.log_alpha = jnp.array(math.log(init_alpha), jnp.float32)
        # Single packed / padded weight buffer consumed by the fused kernel.
        self.packed_w = _pack_params(self.actor, self.critic1, self.critic2)

    def forward(self, s, a, target_net):
        if target_net == "critic":
            return _forward_critic_jit(self.log_alpha, s, a, self.packed_w)
        elif target_net == "actor":
            return _forward_actor_jit(self.log_alpha, s, self.packed_w)
        else:
            raise NotImplementedError


# ----------------------------- reference check -----------------------------
def _ref_mlp(x, p):
    w1, b1, w2, b2, w3, b3 = p
    h1 = jnp.maximum(x @ w1 + b1, 0.0)
    h2 = jnp.maximum(h1 @ w2 + b2, 0.0)
    return h2 @ w3 + b3


if __name__ == "__main__":
    key = jax.random.PRNGKey(0)
    k_model, k_s, k_a = jax.random.split(key, 3)

    sac = SACPallas(OBS_DIM, ACTION_DIM, k_model, init_alpha=0.01)

    s = jax.random.normal(k_s, (BATCH, OBS_DIM), jnp.float32)
    a = jax.random.randint(k_a, (BATCH, 1), 0, ACTION_DIM, jnp.int32)

    # critic branch
    q1_val, q2_val = sac.forward(s, a, target_net="critic")
    jax.block_until_ready((q1_val, q2_val))

    # actor branch
    a_prob, log_prob, entropy, min_q = sac.forward(s, a, target_net="actor")
    jax.block_until_ready((a_prob, log_prob, entropy, min_q))

    # pure-JAX reference check
    q1_all = _ref_mlp(s, sac.critic1)
    q2_all = _ref_mlp(s, sac.critic2)
    q1_ref = jnp.take_along_axis(q1_all, a, axis=1)
    q2_ref = jnp.take_along_axis(q2_all, a, axis=1)
    logits = _ref_mlp(s, sac.actor)
    a_prob_ref = jax.nn.softmax(logits, axis=-1)
    log_prob_ref = jax.nn.log_softmax(logits, axis=-1)
    alpha = jnp.exp(sac.log_alpha)
    entropy_ref = jnp.sum(-alpha * a_prob_ref * log_prob_ref, axis=-1, keepdims=True)
    min_q_ref = jnp.sum(a_prob_ref * jnp.minimum(q1_all, q2_all), axis=-1,
                        keepdims=True)

    assert jnp.allclose(q1_val, q1_ref, atol=1e-4, rtol=1e-4)
    assert jnp.allclose(q2_val, q2_ref, atol=1e-4, rtol=1e-4)
    assert jnp.allclose(a_prob, a_prob_ref, atol=1e-4, rtol=1e-4)
    assert jnp.allclose(log_prob, log_prob_ref, atol=1e-4, rtol=1e-4)
    assert jnp.allclose(entropy, entropy_ref, atol=1e-4, rtol=1e-4)
    assert jnp.allclose(min_q, min_q_ref, atol=1e-4, rtol=1e-4)

    print("KERNEL_OK")
</pallas_src>

<mosaic_0001>
module attributes {stable_mosaic.version = 11 : i64} {
  func.func @_sac_fused_kernel(%arg0: memref<1x1xf32, #tpu.memory_space<smem>>, %arg1: memref<8x16xf32, #tpu.memory_space<vmem>>, %arg2: memref<8x1xi32, #tpu.memory_space<vmem>>, %arg3: memref<296x128xf32, #tpu.memory_space<vmem>>, %arg4: memref<8x128xf32, #tpu.memory_space<vmem>>) attributes {dimension_semantics = [], scalar_prefetch = 0 : i64, scratch_operands = 0 : i64, tpu.core_type = #tpu.core_type<tc>} {
    %c0 = arith.constant 0 : index
    %c0_0 = arith.constant 0 : index
    %0 = vector.load %arg1[%c0, %c0_0] : memref<8x16xf32, #tpu.memory_space<vmem>>, vector<8x16xf32>
    %c0_1 = arith.constant 0 : index
    %c0_2 = arith.constant 0 : index
    %1 = vector.load %arg3[%c0_1, %c0_2] : memref<296x128xf32, #tpu.memory_space<vmem>>, vector<16x128xf32>
    %c16 = arith.constant 16 : index
    %c0_3 = arith.constant 0 : index
    %2 = vector.load %arg3[%c16, %c0_3] : memref<296x128xf32, #tpu.memory_space<vmem>>, vector<1x128xf32>
    %c24 = arith.constant 24 : index
    %c0_4 = arith.constant 0 : index
    %3 = vector.load %arg3[%c24, %c0_4] : memref<296x128xf32, #tpu.memory_space<vmem>>, vector<128x128xf32>
    %c152 = arith.constant 152 : index
    %c0_5 = arith.constant 0 : index
    %4 = vector.load %arg3[%c152, %c0_5] : memref<296x128xf32, #tpu.memory_space<vmem>>, vector<1x128xf32>
    %c160 = arith.constant 160 : index
    %c0_6 = arith.constant 0 : index
    %5 = vector.load %arg3[%c160, %c0_6] : memref<296x128xf32, #tpu.memory_space<vmem>>, vector<128x128xf32>
    %c288 = arith.constant 288 : index
    %c0_7 = arith.constant 0 : index
    %6 = vector.load %arg3[%c288, %c0_7] : memref<296x128xf32, #tpu.memory_space<vmem>>, vector<1x128xf32>
    %cst = arith.constant dense<0.000000e+00> : vector<8x128xf32>
    %7 = tpu.matmul %0, %1, %cst {dimension_numbers = #tpu.dot_dimension_numbers<[1], [0], [0], [1], [0, 0, 1, 1], [], []>} : vector<8x16xf32>, vector<16x128xf32>, vector<8x128xf32> -> vector<8x128xf32>
    %8 = vector.broadcast %2 : vector<1x128xf32> to vector<8x128xf32>
    %9 = arith.addf %7, %8 : vector<8x128xf32>
    %cst_8 = arith.constant 0.000000e+00 : f32
    %10 = vector.broadcast %cst_8 : f32 to vector<8x128xf32>
    %11 = arith.maximumf %9, %10 : vector<8x128xf32>
    %cst_9 = arith.constant dense<0.000000e+00> : vector<8x128xf32>
    %12 = tpu.matmul %11, %3, %cst_9 {dimension_numbers = #tpu.dot_dimension_numbers<[1], [0], [0], [1], [0, 0, 1, 1], [], []>} : vector<8x128xf32>, vector<128x128xf32>, vector<8x128xf32> -> vector<8x128xf32>
    %13 = vector.broadcast %4 : vector<1x128xf32> to vector<8x128xf32>
    %14 = arith.addf %12, %13 : vector<8x128xf32>
    %cst_10 = arith.constant 0.000000e+00 : f32
    %15 = vector.broadcast %cst_10 : f32 to vector<8x128xf32>
    %16 = arith.maximumf %14, %15 : vector<8x128xf32>
    %cst_11 = arith.constant dense<0.000000e+00> : vector<8x128xf32>
    %17 = tpu.matmul %16, %5, %cst_11 {dimension_numbers = #tpu.dot_dimension_numbers<[1], [0], [0], [1], [0, 0, 1, 1], [], []>} : vector<8x128xf32>, vector<128x128xf32>, vector<8x128xf32> -> vector<8x128xf32>
    %18 = vector.broadcast %6 : vector<1x128xf32> to vector<8x128xf32>
    %19 = arith.addf %17, %18 : vector<8x128xf32>
    %20 = vector.extract_strided_slice %19 {offsets = [0, 0], sizes = [8, 4], strides = [1, 1]} : vector<8x128xf32> to vector<8x4xf32>
    %21 = vector.extract_strided_slice %19 {offsets = [0, 4], sizes = [8, 4], strides = [1, 1]} : vector<8x128xf32> to vector<8x4xf32>
    %22 = vector.extract_strided_slice %19 {offsets = [0, 8], sizes = [8, 4], strides = [1, 1]} : vector<8x128xf32> to vector<8x4xf32>
    %cst_12 = arith.constant dense<0xFF800000> : vector<8xf32>
    %23 = vector.multi_reduction <maximumf>, %20, %cst_12 [1] : vector<8x4xf32> to vector<8xf32>
    %24 = vector.shape_cast %23 : vector<8xf32> to vector<8x1xf32>
    %25 = vector.broadcast %24 : vector<8x1xf32> to vector<8x4xf32>
    %26 = arith.subf %20, %25 : vector<8x4xf32>
    %27 = math.exp %26 : vector<8x4xf32>
    %cst_13 = arith.constant dense<0.000000e+00> : vector<8xf32>
    %28 = vector.multi_reduction <add>, %27, %cst_13 [1] : vector<8x4xf32> to vector<8xf32>
    %29 = vector.shape_cast %28 : vector<8xf32> to vector<8x1xf32>
    %30 = vector.broadcast %29 : vector<8x1xf32> to vector<8x4xf32>
    %31 = arith.divf %27, %30 : vector<8x4xf32>
    %32 = math.log %29 : vector<8x1xf32>
    %33 = vector.broadcast %32 : vector<8x1xf32> to vector<8x4xf32>
    %34 = arith.subf %26, %33 : vector<8x4xf32>
    %c0_14 = arith.constant 0 : index
    %c0_15 = arith.constant 0 : index
    %35 = memref.load %arg0[%c0_14, %c0_15] : memref<1x1xf32, #tpu.memory_space<smem>>
    %cst_16 = arith.constant 0.000000e+00 : f32
    %36 = vector.broadcast %cst_16 : f32 to vector<8x1xf32>
    %37 = vector.broadcast %35 : f32 to vector<8x1xf32>
    %38 = arith.addf %37, %36 : vector<8x1xf32>
    %39 = math.exp %38 : vector<8x1xf32>
    %40 = arith.mulf %31, %34 : vector<8x4xf32>
    %cst_17 = arith.constant dense<0.000000e+00> : vector<8xf32>
    %41 = vector.multi_reduction <add>, %40, %cst_17 [1] : vector<8x4xf32> to vector<8xf32>
    %42 = vector.shape_cast %41 : vector<8xf32> to vector<8x1xf32>
    %cst_18 = arith.constant 0.000000e+00 : f32
    %43 = vector.broadcast %cst_18 : f32 to vector<8x1xf32>
    %44 = arith.subf %43, %39 : vector<8x1xf32>
    %45 = arith.mulf %44, %42 : vector<8x1xf32>
    %46 = arith.minimumf %21, %22 : vector<8x4xf32>
    %47 = arith.mulf %31, %46 : vector<8x4xf32>
    %cst_19 = arith.constant dense<0.000000e+00> : vector<8xf32>
    %48 = vector.multi_reduction <add>, %47, %cst_19 [1] : vector<8x4xf32> to vector<8xf32>
    %49 = vector.shape_cast %48 : vector<8xf32> to vector<8x1xf32>
    %c0_20 = arith.constant 0 : index
    %c0_21 = arith.constant 0 : index
    %50 = vector.load %arg2[%c0_20, %c0_21] : memref<8x1xi32, #tpu.memory_space<vmem>>, vector<8x1xi32>
    %51 = tpu.iota {dimensions = array<i32: 1>} : vector<8x4xi32>
    %52 = vector.broadcast %50 : vector<8x1xi32> to vector<8x4xi32>
    %53 = arith.cmpi eq, %51, %52 : vector<8x4xi32>
    %54 = arith.extui %53 : vector<8x4xi1> to vector<8x4xi32>
    %55 = arith.sitofp %54 : vector<8x4xi32> to vector<8x4xf32>
    %56 = arith.mulf %21, %55 : vector<8x4xf32>
    %cst_22 = arith.constant dense<0.000000e+00> : vector<8xf32>
    %57 = vector.multi_reduction <add>, %56, %cst_22 [1] : vector<8x4xf32> to vector<8xf32>
    %58 = vector.shape_cast %57 : vector<8xf32> to vector<8x1xf32>
    %59 = arith.mulf %22, %55 : vector<8x4xf32>
    %cst_23 = arith.constant dense<0.000000e+00> : vector<8xf32>
    %60 = vector.multi_reduction <add>, %59, %cst_23 [1] : vector<8x4xf32> to vector<8xf32>
    %61 = vector.shape_cast %60 : vector<8xf32> to vector<8x1xf32>
    %cst_24 = arith.constant 0.000000e+00 : f32
    %62 = vector.broadcast %cst_24 : f32 to vector<8x116xf32>
    %63 = tpu.concatenate %31, %34, %58, %61, %45, %49, %62 in 1 : vector<8x4xf32>, vector<8x4xf32>, vector<8x1xf32>, vector<8x1xf32>, vector<8x1xf32>, vector<8x1xf32>, vector<8x116xf32> -> vector<8x128xf32>
    %c0_25 = arith.constant 0 : index
    %c0_26 = arith.constant 0 : index
    %64 = vector.load %arg4[%c0_25, %c0_26] : memref<8x128xf32, #tpu.memory_space<vmem>>, vector<8x128xf32>
    tpu.vector_store %arg4[%c0_25, %c0_26], %63 {strides = array<i32>} : memref<8x128xf32, #tpu.memory_space<vmem>>, vector<8x128xf32>,
    return
  }
}

</mosaic_0001>

<bundles_post_ra>
// kernel: _forward_critic_jit.1
= control target key start
LH: loop header
LB: loop body
LE: loop exit
PB: predicated region body
PF: predicated region fallthrough
CT: control target
= control target key end

     0   :  { %10 = vsyncpa [#allocation4], 0  ;;  %s294_s18 = smov [#allocation3]   ;;  %s295_s20 = smov 128   ;;  %s353_s0 = inlined_call_operand.<no memory space> [shape: f32[1,1], index: 0, kind: input, shape index: {}]   ;;  %s354_s1 = inlined_call_operand.vmem [shape: f32[8,16], index: 1, kind: input, shape index: {}]   ;;  %s355_s2 = inlined_call_operand.vmem [shape: s32[8,1], index: 2, kind: input, shape index: {}]   ;;  %s356_s3 = inlined_call_operand.hbm [shape: f32[296,128], index: 3, kind: input, shape index: {}]   ;;  %s357_s4 = inlined_call_operand.vmem [shape: f32[8,128], index: 4, kind: output, shape index: {}]  }
   0x1   :  { %s21_s17 = sshll.u32 %s356_s3, 4  ;;  %s23_s19 = sshll.u32 %s294_s18, 4  ;;  %s22_s17 = int_to_ptr.hbm [resolvable:$true] %s21_s17  ;;  %s24_s19 = int_to_ptr.vmem [resolvable:$true] %s23_s19 }
   0x2   :  { %s296_s21 = smov 8  }
   0x3   :  { %29 = dma.hbm_to_vmem [thread:$0]  %s22_s17, 4736, %s24_s19, [#allocation4], %s295_s20, %s295_s20, %s296_s21  }
   0x4   :  { %292 = dma.done.wait [#allocation4], 4736  }
   0x5   :  { %293 = vsyncadd [#allocation4], 4294962560  ;;  %v36_v0 = vld [vmem:[#allocation3 + $0x8] sm:$0xff]  ;;  %v35_v1 = vld [vmem:[#allocation3] sm:$0xff]  ;;  %vm73_vm0 = vcmask 130048   ;;  %v297_v22 = vmov 0   ;;  %v194_v41 = vlaneseq }
   0x6   :  { %91 = vmatpush.msra.mxu0 %v36_v0  ;;  %v34_v2 = vld [vmem:[%s354_s1] sm:$0xff]  ;;  %v53_v3 = vld [vmem:[#allocation3 + $0x90] sm:$0xff]  ;;  %v52_v4 = vld [vmem:[#allocation3 + $0x88] sm:$0xff]  ;;  %256 = vset.pattern.permute.xlu0 %v297_v22  ;;  %v298_v44 = vmov 0.0   ;;  %vm141_vm2 = vcmask 31744   ;;  %s300_s24 = smov 124  }
   0x7   :  { %99 = vmatpush.msra.mxu1 %v53_v3  ;;  %v51_v5 = vld [vmem:[#allocation3 + $0x80] sm:$0xff]  ;;  %v50_v6 = vld [vmem:[#allocation3 + $0x78] sm:$0xff]  ;;  %v49_v7 = vld [vmem:[#allocation3 + $0x70] sm:$0xff]  ;;  %v195_v43 = vand.u32 127, %v194_v41  ;;  %s301_s25 = smov 120   ;;  %vm230_vm7 = vcmask 64512  }
   0x8   :  { %92 = vmatpush.msra.mxu0 %v35_v1  ;;  %v48_v8 = vld [vmem:[#allocation3 + $0x68] sm:$0xff]  ;;  %v47_v9 = vld [vmem:[#allocation3 + $0x60] sm:$0xff]  ;;  %v46_v10 = vld [vmem:[#allocation3 + $0x58] sm:$0xff]  ;;  %vm232_vm8 = vcmask 72704   ;;  %vm234_vm9 = vcmask 80896   ;;  %vm236_vm10 = vcmask 89088  }
   0x9   :  { %246 = vmatmul.msk.f32.vlgmr.msra.gmra.mxu0 %vm73_vm0, %v34_v2  ;;  %100 = vmatpush.msra.mxu1 %v52_v4  ;;  %v45_v11 = vld [vmem:[#allocation3 + $0x50] sm:$0xff]  ;;  %v44_v12 = vld [vmem:[#allocation3 + $0x48] sm:$0xff]  ;;  %v43_v13 = vld [vmem:[#allocation3 + $0x40] sm:$0xff]  ;;  %vm238_vm11 = vcmask 97280  }
   0xa   :  { %v42_v14 = vld [vmem:[#allocation3 + $0x38] sm:$0xff]  ;;  %v41_v15 = vld [vmem:[#allocation3 + $0x30] sm:$0xff]  ;;  %v40_v16 = vld [vmem:[#allocation3 + $0x28] sm:$0xff] }
   0xb   :  { %101 = vmatpush.msra.mxu1 %v51_v5  ;;  %v39_v17 = vld [vmem:[#allocation3 + $0x20] sm:$0xff]  ;;  %v38_v18 = vld [vmem:[#allocation3 + $0x18] sm:$0xff]  ;;  %v69_v21 = vld [vmem:[#allocation3 + $0x110] sm:$0xff] }
   0xc   :  { %v193_v19 = vld [vmem:[%s355_s2] sm:$0xff]  ;;  %v70_v20 = vld [vmem:[#allocation3 + $0x118] sm:$0xff]  ;;  %v68_v23 = vld [vmem:[#allocation3 + $0x108] sm:$0xff]  ;;  %s299_s2 = smov 4  }
   0xd   :  { %102 = vmatpush.msra.mxu1 %v50_v6  ;;  %121 = vmatpush.msra.mxu2 %v70_v20  ;;  %v67_v24 = vld [vmem:[#allocation3 + $0x100] sm:$0xff]  ;;  %v66_v25 = vld [vmem:[#allocation3 + $0xf8] sm:$0xff]  ;;  %v65_v26 = vld [vmem:[#allocation3 + $0xf0] sm:$0xff] }
   0xe   :  { %197 = vperm.xlu0 %256, %v193_v19   ;;  %v64_v27 = vld [vmem:[#allocation3 + $0xe8] sm:$0xff]  ;;  %v63_v28 = vld [vmem:[#allocation3 + $0xe0] sm:$0xff]  ;;  %v62_v29 = vld [vmem:[#allocation3 + $0xd8] sm:$0xff] }
   0xf   :  { %103 = vmatpush.msra.mxu1 %v49_v7  ;;  %122 = vmatpush.msra.mxu2 %v69_v21  ;;  %v61_v30 = vld [vmem:[#allocation3 + $0xd0] sm:$0xff]  ;;  %v60_v31 = vld [vmem:[#allocation3 + $0xc8] sm:$0xff]  ;;  %v59_v32 = vld [vmem:[#allocation3 + $0xc0] sm:$0xff] }
  0x10   :  { %v58_v33 = vld [vmem:[#allocation3 + $0xb8] sm:$0xff]  ;;  %v257_v34 = vld [vmem:[#allocation3 + $0x10] ss:$0 sm:$0xff]  ;;  %v56_v39 = vld [vmem:[#allocation3 + $0xa8] sm:$0xff] }
  0x11   :  { %104 = vmatpush.msra.mxu1 %v48_v8  ;;  %123 = vmatpush.msra.mxu2 %v68_v23  ;;  %v57_v38 = vld [vmem:[#allocation3 + $0xb0] sm:$0xff]  ;;  %v55_v40 = vld [vmem:[#allocation3 + $0xa0] sm:$0xff]  ;;  %v258_v46 = vld [vmem:[#allocation3 + $0x98] ss:$0 sm:$0xff] }
  0x12   :  { %v259_v50 = vld [vmem:[#allocation3 + $0x120] ss:$0 sm:$0xff] }
  0x13   :  { %105 = vmatpush.msra.mxu1 %v47_v9  ;;  %124 = vmatpush.msra.mxu2 %v67_v24 }
  0x15   :  { %106 = vmatpush.msra.mxu1 %v46_v10  ;;  %125 = vmatpush.msra.mxu2 %v66_v25  ;;  %v170_v25 = vstv %s353_s0 }
  0x17   :  { %107 = vmatpush.msra.mxu1 %v45_v11  ;;  %126 = vmatpush.msra.mxu2 %v65_v26  ;;  %v172_v26 = vmul.f32 1.442695, %v170_v25 }
  0x19   :  { %108 = vmatpush.msra.mxu1 %v44_v12  ;;  %127 = vmatpush.msra.mxu2 %v64_v27 }
  0x1b   :  { %109 = vmatpush.msra.mxu1 %v43_v13  ;;  %128 = vmatpush.msra.mxu2 %v63_v28 }
  0x1d   :  { %110 = vmatpush.msra.mxu1 %v42_v14  ;;  %129 = vmatpush.msra.mxu2 %v62_v29 }
  0x1f   :  { %111 = vmatpush.msra.mxu1 %v41_v15  ;;  %130 = vmatpush.msra.mxu2 %v61_v30 }
  0x21   :  { %112 = vmatpush.msra.mxu1 %v40_v16  ;;  %131 = vmatpush.msra.mxu2 %v60_v31 }
  0x23   :  { %113 = vmatpush.msra.mxu1 %v39_v17  ;;  %132 = vmatpush.msra.mxu2 %v59_v32 }
  0x25   :  { %114 = vmatpush.msra.mxu1 %v38_v18  ;;  %133 = vmatpush.msra.mxu2 %v58_v33 }
  0x27   :  { %134 = vmatpush.msra.mxu2 %v57_v38 }
  0x29   :  { %135 = vmatpush.msra.mxu2 %v56_v39 }
  0x2b   :  { %136 = vmatpush.msra.mxu2 %v55_v40 }
  0x80   :  { %v198_v42 = vpop.permute.xlu0 %197 }
  0x81   :  { %vm199_vm1 = vcmp.eq.s32.totalorder %v195_v43, %v198_v42 }
  0x82   :  { %v247_v45 = vsel %vm199_vm1, 1.0, %v298_v44 }
  0x83   :  { %203 = vrot.lane.b32.xlu1 %v247_v45, %s299_s2  ;;  %214 = vrot.lane.b32.xlu2 %v247_v45, %s296_s21 }
  0x86   :  { %v94_v35 = vpop.f32.mrf.mxu0 }
  0x87   :  { %v95_v36 = vadd.f32 %v257_v34, %v94_v35 }
  0x89   :  { %v97_v37 = vmax.f32 %v95_v36, 0.0 }
  0x8b   :  { %115 = vmatmul.f32.vlgmr.msra.gmra.mxu1 %v97_v37 }
  0xdd   :  { %v215_v61 = vpop.permute.xlu2 %214 }
  0xf5   :  { %v204_v54 = vpop.permute.xlu1 %203 }
 0x108   :  { %v116_v47 = vpop.f32.mrf.mxu1 }
 0x109   :  { %v117_v48 = vadd.f32 %v258_v46, %v116_v47 }
 0x10b   :  { %v119_v49 = vmax.f32 %v117_v48, 0.0 }
 0x10d   :  { %137 = vmatmul.f32.vlgmr.msra.gmra.mxu2 %v119_v49 }
 0x190   :  { %v138_v51 = vpop.f32.mrf.mxu2 }
 0x191   :  { %v139_v52 = vadd.f32 %v259_v50, %v138_v51 }
 0x193   :  { %181 = vrot.lane.b32.xlu1 %v139_v52, %s300_s24  ;;  %v142_v53 = vsel %vm141_vm2, %v139_v52, -inf  ;;  %v206_v55 = vmul.f32 %v204_v54, %v139_v52  ;;  %v217_v62 = vmul.f32 %v215_v61, %v139_v52 }
 0x194   :  { %143 = vmax.xlane.f32.xlu0 %v142_v53 }
 0x19b   :  { %208 = vrot.lane.b32.xlu1 %v206_v55, %s300_s24 }
 0x205   :  { %v182_v56 = vpop.permute.xlu1 %181 }
 0x206   :  { %v184_v57 = vmin.f32 %v139_v52, %v182_v56 }
 0x207   :  { %v144_v58 = vpop.xlane.xlu0 %143 }
 0x208   :  { %v145_v59 = vsub.f32 %v139_v52, %v144_v58  ;;  %186 = vrot.lane.b32.xlu1 %v184_v57, %s300_s24 }
 0x20a   :  { %v146_v60 = vmul.f32 1.442695, %v145_v59 }
 0x20c   :  { %260 = vpow2.f32 %v146_v60 }
 0x20d   :  { %v209_v1 = vpop.permute.xlu1 %208 }
 0x20e   :  { %v211_v2 = vsel %vm141_vm2, %v209_v1, 0.0 }
 0x210   :  { %219 = vrot.lane.b32.xlu1 %v217_v62, %s301_s25 }
 0x212   :  { %v261_v63 = vpop.eup %260 }
 0x213   :  { %v148_v0 = vsel %vm141_vm2, %v261_v63, 0.0 }
 0x214   :  { %149 = vadd.xlane.f32.xlu2 %v148_v0 }
 0x21c   :  { %212 = vadd.xlane.f32.xlu2 %v211_v2 }
 0x27a   :  { %v187_v3 = vpop.permute.xlu1 %186 }
 0x282   :  { %v220_v4 = vpop.permute.xlu1 %219 }
 0x283   :  { %v222_v5 = vsel %vm141_vm2, %v220_v4, 0.0 }
 0x284   :  { %223 = vadd.xlane.f32.xlu2 %v222_v5 }
 0x287   :  { %v150_v6 = vpop.xlane.xlu2 %149 }
 0x288   :  { %262 = vrcp.f32 %v150_v6  ;;  %v162_v12 = vand.u32 2147483648, %v150_v6  ;;  %v160_v15 = vand.u32 2147483647, %v150_v6  ;;  %vm156_vm4 = vweird.f32 %v150_v6 }
 0x289   :  { %264 = vlog2.f32 %v150_v6 }
 0x28a   :  { %v163_v17 = vor.u32 1.1754944e-38, %v162_v12  ;;  %vm161_vm6 = vcmp.eq.f32.partialorder %v160_v15, 8.507059e+37  ;;  %266 = vpow2.f32 %v172_v26 }
 0x28e   :  { %v263_v7 = vpop.eup %262 }
 0x28f   :  { %v265_v8 = vpop.eup %264  ;;  %v152_v9 = vmul.f32 %v263_v7, %v150_v6  ;;  %vm157_vm3 = vweird.f32 %v263_v7  ;;  %v213_v27 = vpop.xlane.xlu2 %212 }
 0x290   :  { %v167_v10 = vmul.f32 0.6931472, %v265_v8  ;;  %vm158_vm5 = vmor %vm156_vm4, %vm157_vm3  ;;  %v267_v29 = vpop.eup %266 }
 0x291   :  { %v153_v11 = vsub.f32 1.0, %v152_v9  ;;  %v178_v32 = vsub.f32 0.0, %v267_v29 }
 0x292   :  { %v168_v13 = vsub.f32 %v145_v59, %v167_v10 }
 0x293   :  { %v154_v14 = vmul.f32 %v263_v7, %v153_v11 }
 0x294   :  { %226 = vrot.lane.b32.xlu0 %v168_v13, %s299_s2 }
 0x295   :  { %v155_v16 = vadd.f32 %v263_v7, %v154_v14 }
 0x297   :  { %v159_v18 = vsel %vm158_vm5, %v263_v7, %v155_v16 }
 0x298   :  { %v164_v19 = vsel %vm161_vm6, %v163_v17, %v159_v18 }
 0x299   :  { %v165_v20 = vmul.f32 %v261_v63, %v164_v19 }
 0x29b   :  { %v189_v21 = vmul.f32 %v187_v3, %v165_v20  ;;  %v174_v22 = vmul.f32 %v168_v13, %v165_v20 }
 0x29d   :  { %v190_v23 = vsel %vm141_vm2, %v189_v21, 0.0  ;;  %v175_v24 = vsel %vm141_vm2, %v174_v22, 0.0 }
 0x29e   :  { %191 = vadd.xlane.f32.xlu2 %v190_v23  ;;  %176 = vadd.xlane.f32.xlu1 %v175_v24 }
 0x2f7   :  { %v224_v30 = vpop.xlane.xlu2 %223 }
 0x306   :  { %v227_v28 = vpop.permute.xlu0 %226 }
 0x307   :  { %v229_v31 = vsel %vm141_vm2, %v165_v20, %v227_v28 }
 0x308   :  { %v231_v33 = vsel %vm230_vm7, %v229_v31, %v213_v27 }
 0x309   :  { %v233_v36 = vsel %vm232_vm8, %v231_v33, %v224_v30 }
 0x311   :  { %v177_v34 = vpop.xlane.xlu1 %176  ;;  %v192_v38 = vpop.xlane.xlu2 %191 }
 0x312   :  { %v179_v35 = vmul.f32 %v178_v32, %v177_v34 }
 0x314   :  { %v235_v37 = vsel %vm234_vm9, %v233_v36, %v179_v35 }
 0x315   :  { %v237_v39 = vsel %vm236_vm10, %v235_v37, %v192_v38 }
 0x316   :  { %v239_v40 = vsel %vm238_vm11, %v237_v39, 0.0 }
 0x317   :  { %240 = vst [vmem:[%s357_s4] sm:$0xff] %v239_v40 }
 0x318   :  { %245 = vsyncpa [#allocation4], 1 }

</bundles_post_ra>
